<compile_context>
chip_gen: v7x
topology: tpu7x:2x2x1
jax: 0.10.0
libtpu: 0.0.40
codegen_flags: <defaults>
</compile_context>

<pallas_src>
import jax
import jax.numpy as jnp
from jax.experimental import pallas as pl
from jax.experimental.pallas import tpu as pltpu


def _cdiv(a, b):
    return (a + b - 1) // b


def _round_up(x, m):
    return ((x + m - 1) // m) * m


# Batches at/above this size that still fit one tile get split into >=2 grid steps so the
# "parallel" batch axis can shard across v7x's two TensorCores.
_MEGACORE_SPLIT_ROWS = 1024


def _select_batch_tile(B, batch_tile):
    batch_tile = max(8, _round_up(batch_tile, 8))
    if B <= batch_tile:
        if B >= _MEGACORE_SPLIT_ROWS:
            # moderate batch: force >=2 grid steps (megacore), keep tile a multiple of 8
            return _round_up(_cdiv(B, 2), 8)
        # single step; bt == B (full array dim) is always a legal block dim
        return B
    return batch_tile


def decoder_kernel(z_ref, w1_ref, b1_ref, w2_ref, b2_ref, w3_ref, b3_ref, out_ref):
    # in-kernel f32 -> bf16 cast (VPU) feeding the MXU; f32 accumulation throughout
    z = z_ref[...].astype(jnp.bfloat16)
    # layer 1: Linear(latent -> out/4) + ReLU
    h1 = jnp.dot(z, w1_ref[...], preferred_element_type=jnp.float32) + b1_ref[...]
    h1 = jnp.maximum(h1, 0.0).astype(jnp.bfloat16)
    # layer 2: Linear(out/4 -> out/2) + ReLU
    h2 = jnp.dot(h1, w2_ref[...], preferred_element_type=jnp.float32) + b2_ref[...]
    h2 = jnp.maximum(h2, 0.0).astype(jnp.bfloat16)
    # layer 3: Linear(out/2 -> out) + Sigmoid (tanh form: single EUP op, overflow-free)
    o = jnp.dot(h2, w3_ref[...], preferred_element_type=jnp.float32) + b3_ref[...]
    out_ref[...] = (0.5 * (jnp.tanh(0.5 * o) + 1.0)).astype(out_ref.dtype)


def decoder_forward(z, w1, b1, w2, b2, w3, b3, *, batch_tile=2048, out_dtype=jnp.float32):
    B, latent = z.shape
    h1 = w1.shape[1]
    h2 = w2.shape[1]
    out = w3.shape[1]
    assert w1.shape[0] == latent and w2.shape[0] == h1 and w3.shape[0] == h2

    bt = _select_batch_tile(B, batch_tile)
    grid = (_cdiv(B, bt),)

    # resident bf16 weights (tiny, DMA'd once); f32 biases added to the f32 accumulator
    z_f = z.astype(jnp.float32)
    w1b = w1.astype(jnp.bfloat16)
    w2b = w2.astype(jnp.bfloat16)
    w3b = w3.astype(jnp.bfloat16)
    b1f = b1.astype(jnp.float32).reshape(1, -1)
    b2f = b2.astype(jnp.float32).reshape(1, -1)
    b3f = b3.astype(jnp.float32).reshape(1, -1)

    return pl.pallas_call(
        decoder_kernel,
        out_shape=jax.ShapeDtypeStruct((B, out), out_dtype),
        grid_spec=pltpu.PrefetchScalarGridSpec(
            num_scalar_prefetch=0,
            grid=grid,
            in_specs=[
                pl.BlockSpec((bt, latent), lambda i: (i, 0)),   # z tile (f32, cast in-kernel)
                pl.BlockSpec((latent, h1), lambda i: (0, 0)),   # W1 (whole, resident)
                pl.BlockSpec((1, h1), lambda i: (0, 0)),        # b1
                pl.BlockSpec((h1, h2), lambda i: (0, 0)),       # W2
                pl.BlockSpec((1, h2), lambda i: (0, 0)),        # b2
                pl.BlockSpec((h2, out), lambda i: (0, 0)),      # W3
                pl.BlockSpec((1, out), lambda i: (0, 0)),       # b3
            ],
            out_specs=pl.BlockSpec((bt, out), lambda i: (i, 0)),
        ),
        compiler_params=pltpu.CompilerParams(
            dimension_semantics=("parallel",),  # batch axis: megacore-shardable
        ),
    )(z_f, w1b, b1f, w2b, b2f, w3b, b3f)


def reference_forward(z, w1, b1, w2, b2, w3, b3):
    h1 = jnp.maximum(z @ w1 + b1, 0.0)
    h2 = jnp.maximum(h1 @ w2 + b2, 0.0)
    return jax.nn.sigmoid(h2 @ w3 + b3)


if __name__ == "__main__":
    # Decoder(latent_size=32, out_size=128) => hidden sizes 32, 64, output 128
    latent_size = 32
    out_size = 128
    h1_size = out_size // 4   # 32
    h2_size = out_size // 2   # 64

    key = jax.random.PRNGKey(0)
    k = jax.random.split(key, 7)

    def init_w(kk, fan_in, fan_out):
        bound = 1.0 / (fan_in ** 0.5)
        return jax.random.uniform(kk, (fan_in, fan_out), jnp.float32, -bound, bound)

    w1 = init_w(k[1], latent_size, h1_size)
    b1 = jax.random.uniform(k[2], (1, h1_size), jnp.float32, -0.1, 0.1)
    w2 = init_w(k[3], h1_size, h2_size)
    b2 = jax.random.uniform(k[4], (1, h2_size), jnp.float32, -0.1, 0.1)
    w3 = init_w(k[5], h2_size, out_size)
    b3 = jax.random.uniform(k[6], (1, out_size), jnp.float32, -0.1, 0.1)

    # Small-batch path: single grid step, bt == B, no padding anywhere.
    batch = 8
    z = jax.random.normal(k[0], (batch, latent_size), jnp.float32)
    out = jax.block_until_ready(decoder_forward(z, w1, b1, w2, b2, w3, b3))
    ref = reference_forward(z, w1, b1, w2, b2, w3, b3)
    assert out.shape == (batch, out_size)
    # bf16 matmul inputs -> loosen tolerance vs f32 reference
    assert jnp.allclose(out, ref, atol=3e-2, rtol=3e-2), "mismatch vs reference (small batch)"

    # Multi-step path with a ragged (masked) last block: 384 rows, 256-row tile -> grid=2,
    # last block only half valid. No batch padding, no output slice.
    batch2 = 384
    z2 = jax.random.normal(jax.random.PRNGKey(1), (batch2, latent_size), jnp.float32)
    out2 = jax.block_until_ready(decoder_forward(z2, w1, b1, w2, b2, w3, b3, batch_tile=256))
    ref2 = reference_forward(z2, w1, b1, w2, b2, w3, b3)
    assert out2.shape == (batch2, out_size)
    assert jnp.allclose(out2, ref2, atol=3e-2, rtol=3e-2), "mismatch vs reference (tiled batch)"

    # bf16-output fast path (halves the dominant HBM writeback on this mem-bound kernel).
    out3 = jax.block_until_ready(
        decoder_forward(z2, w1, b1, w2, b2, w3, b3, batch_tile=256, out_dtype=jnp.bfloat16)
    )
    assert out3.dtype == jnp.bfloat16
    assert jnp.allclose(out3.astype(jnp.float32), ref2, atol=3e-2, rtol=3e-2), \
        "mismatch vs reference (bf16 output)"

    print("KERNEL_OK")
</pallas_src>

<mosaic_0001>
module attributes {stable_mosaic.version = 11 : i64} {
  func.func @decoder_kernel(%arg0: i32, %arg1: memref<8x32xf32, #tpu.memory_space<vmem>>, %arg2: memref<32x32xbf16, #tpu.memory_space<vmem>>, %arg3: memref<1x32xf32, #tpu.memory_space<vmem>>, %arg4: memref<32x64xbf16, #tpu.memory_space<vmem>>, %arg5: memref<1x64xf32, #tpu.memory_space<vmem>>, %arg6: memref<64x128xbf16, #tpu.memory_space<vmem>>, %arg7: memref<1x128xf32, #tpu.memory_space<vmem>>, %arg8: memref<8x128xf32, #tpu.memory_space<vmem>>) attributes {dimension_semantics = [#tpu.dimension_semantics<parallel>], iteration_bounds = array<i64: 1>, scalar_prefetch = 0 : i64, scratch_operands = 0 : i64, tpu.core_type = #tpu.core_type<tc>, window_params = [{transform_indices = @transform_0, window_bounds = array<i64: 8, 32>}, {pipeline_mode = #tpu.pipeline_mode<synchronous>, transform_indices = @transform_1, window_bounds = array<i64: 32, 32>}, {pipeline_mode = #tpu.pipeline_mode<synchronous>, transform_indices = @transform_2, window_bounds = array<i64: 1, 32>}, {pipeline_mode = #tpu.pipeline_mode<synchronous>, transform_indices = @transform_3, window_bounds = array<i64: 32, 64>}, {pipeline_mode = #tpu.pipeline_mode<synchronous>, transform_indices = @transform_4, window_bounds = array<i64: 1, 64>}, {pipeline_mode = #tpu.pipeline_mode<synchronous>, transform_indices = @transform_5, window_bounds = array<i64: 64, 128>}, {pipeline_mode = #tpu.pipeline_mode<synchronous>, transform_indices = @transform_6, window_bounds = array<i64: 1, 128>}, {transform_indices = @transform_7, window_bounds = array<i64: 8, 128>}]} {
    %c0 = arith.constant 0 : index
    %c0_0 = arith.constant 0 : index
    %0 = vector.load %arg1[%c0, %c0_0] : memref<8x32xf32, #tpu.memory_space<vmem>>, vector<8x32xf32>
    %1 = arith.truncf %0 : vector<8x32xf32> to vector<8x32xbf16>
    %c0_1 = arith.constant 0 : index
    %c0_2 = arith.constant 0 : index
    %2 = vector.load %arg2[%c0_1, %c0_2] : memref<32x32xbf16, #tpu.memory_space<vmem>>, vector<32x32xbf16>
    %cst = arith.constant dense<0.000000e+00> : vector<8x32xf32>
    %3 = tpu.matmul %1, %2, %cst {dimension_numbers = #tpu.dot_dimension_numbers<[1], [0], [0], [1], [0, 0, 1, 1], [], []>} : vector<8x32xbf16>, vector<32x32xbf16>, vector<8x32xf32> -> vector<8x32xf32>
    %c0_3 = arith.constant 0 : index
    %c0_4 = arith.constant 0 : index
    %4 = vector.load %arg3[%c0_3, %c0_4] : memref<1x32xf32, #tpu.memory_space<vmem>>, vector<1x32xf32>
    %5 = vector.broadcast %4 : vector<1x32xf32> to vector<8x32xf32>
    %6 = arith.addf %3, %5 : vector<8x32xf32>
    %cst_5 = arith.constant 0.000000e+00 : f32
    %7 = vector.broadcast %cst_5 : f32 to vector<8x32xf32>
    %8 = arith.maximumf %6, %7 : vector<8x32xf32>
    %9 = arith.truncf %8 : vector<8x32xf32> to vector<8x32xbf16>
    %c0_6 = arith.constant 0 : index
    %c0_7 = arith.constant 0 : index
    %10 = vector.load %arg4[%c0_6, %c0_7] : memref<32x64xbf16, #tpu.memory_space<vmem>>, vector<32x64xbf16>
    %cst_8 = arith.constant dense<0.000000e+00> : vector<8x64xf32>
    %11 = tpu.matmul %9, %10, %cst_8 {dimension_numbers = #tpu.dot_dimension_numbers<[1], [0], [0], [1], [0, 0, 1, 1], [], []>} : vector<8x32xbf16>, vector<32x64xbf16>, vector<8x64xf32> -> vector<8x64xf32>
    %c0_9 = arith.constant 0 : index
    %c0_10 = arith.constant 0 : index
    %12 = vector.load %arg5[%c0_9, %c0_10] : memref<1x64xf32, #tpu.memory_space<vmem>>, vector<1x64xf32>
    %13 = vector.broadcast %12 : vector<1x64xf32> to vector<8x64xf32>
    %14 = arith.addf %11, %13 : vector<8x64xf32>
    %cst_11 = arith.constant 0.000000e+00 : f32
    %15 = vector.broadcast %cst_11 : f32 to vector<8x64xf32>
    %16 = arith.maximumf %14, %15 : vector<8x64xf32>
    %17 = arith.truncf %16 : vector<8x64xf32> to vector<8x64xbf16>
    %c0_12 = arith.constant 0 : index
    %c0_13 = arith.constant 0 : index
    %18 = vector.load %arg6[%c0_12, %c0_13] : memref<64x128xbf16, #tpu.memory_space<vmem>>, vector<64x128xbf16>
    %cst_14 = arith.constant dense<0.000000e+00> : vector<8x128xf32>
    %19 = tpu.matmul %17, %18, %cst_14 {dimension_numbers = #tpu.dot_dimension_numbers<[1], [0], [0], [1], [0, 0, 1, 1], [], []>} : vector<8x64xbf16>, vector<64x128xbf16>, vector<8x128xf32> -> vector<8x128xf32>
    %c0_15 = arith.constant 0 : index
    %c0_16 = arith.constant 0 : index
    %20 = vector.load %arg7[%c0_15, %c0_16] : memref<1x128xf32, #tpu.memory_space<vmem>>, vector<1x128xf32>
    %21 = vector.broadcast %20 : vector<1x128xf32> to vector<8x128xf32>
    %22 = arith.addf %19, %21 : vector<8x128xf32>
    %cst_17 = arith.constant 5.000000e-01 : f32
    %23 = vector.broadcast %cst_17 : f32 to vector<8x128xf32>
    %24 = arith.mulf %23, %22 : vector<8x128xf32>
    %25 = math.tanh %24 : vector<8x128xf32>
    %cst_18 = arith.constant 1.000000e+00 : f32
    %26 = vector.broadcast %cst_18 : f32 to vector<8x128xf32>
    %27 = arith.addf %25, %26 : vector<8x128xf32>
    %cst_19 = arith.constant 5.000000e-01 : f32
    %28 = vector.broadcast %cst_19 : f32 to vector<8x128xf32>
    %29 = arith.mulf %28, %27 : vector<8x128xf32>
    %c0_20 = arith.constant 0 : index
    %c0_21 = arith.constant 0 : index
    %30 = vector.load %arg8[%c0_20, %c0_21] : memref<8x128xf32, #tpu.memory_space<vmem>>, vector<8x128xf32>
    tpu.vector_store %arg8[%c0_20, %c0_21], %29 {strides = array<i32>} : memref<8x128xf32, #tpu.memory_space<vmem>>, vector<8x128xf32>,
    return
  }
  func.func @transform_0(%arg0: i32) -> (i32, i32) {
    %c0_i32 = arith.constant 0 : i32
    %c0_i32_0 = arith.constant 0 : i32
    return %arg0, %c0_i32 : i32, i32
  }
  func.func @transform_1(%arg0: i32) -> (i32, i32) {
    %c0_i32 = arith.constant 0 : i32
    %c0_i32_0 = arith.constant 0 : i32
    %c0_i32_1 = arith.constant 0 : i32
    return %c0_i32, %c0_i32_0 : i32, i32
  }
  func.func @transform_2(%arg0: i32) -> (i32, i32) {
    %c0_i32 = arith.constant 0 : i32
    %c0_i32_0 = arith.constant 0 : i32
    %c0_i32_1 = arith.constant 0 : i32
    return %c0_i32, %c0_i32_0 : i32, i32
  }
  func.func @transform_3(%arg0: i32) -> (i32, i32) {
    %c0_i32 = arith.constant 0 : i32
    %c0_i32_0 = arith.constant 0 : i32
    %c0_i32_1 = arith.constant 0 : i32
    return %c0_i32, %c0_i32_0 : i32, i32
  }
  func.func @transform_4(%arg0: i32) -> (i32, i32) {
    %c0_i32 = arith.constant 0 : i32
    %c0_i32_0 = arith.constant 0 : i32
    %c0_i32_1 = arith.constant 0 : i32
    return %c0_i32, %c0_i32_0 : i32, i32
  }
  func.func @transform_5(%arg0: i32) -> (i32, i32) {
    %c0_i32 = arith.constant 0 : i32
    %c0_i32_0 = arith.constant 0 : i32
    %c0_i32_1 = arith.constant 0 : i32
    return %c0_i32, %c0_i32_0 : i32, i32
  }
  func.func @transform_6(%arg0: i32) -> (i32, i32) {
    %c0_i32 = arith.constant 0 : i32
    %c0_i32_0 = arith.constant 0 : i32
    %c0_i32_1 = arith.constant 0 : i32
    return %c0_i32, %c0_i32_0 : i32, i32
  }
  func.func @transform_7(%arg0: i32) -> (i32, i32) {
    %c0_i32 = arith.constant 0 : i32
    %c0_i32_0 = arith.constant 0 : i32
    return %arg0, %c0_i32 : i32, i32
  }
}

</mosaic_0001>

<bundles_post_ra>
// kernel: tpu_custom_call.1
= control target key start
LH: loop header
LB: loop body
LE: loop exit
PB: predicated region body
PF: predicated region fallthrough
CT: control target
= control target key end

     0   :  { %12 = vsyncpa [#allocation3], 0  ;;  %s647_s0 = inlined_call_operand.hbm [shape: f32[8,32], index: 0, kind: input, shape index: {}]   ;;  %s648_s1 = inlined_call_operand.hbm [shape: bf16[32,32], index: 1, kind: input, shape index: {}]   ;;  %s649_s2 = inlined_call_operand.vmem [shape: f32[1,32], index: 2, kind: input, shape index: {}]   ;;  %s650_s3 = inlined_call_operand.hbm [shape: bf16[32,64], index: 3, kind: input, shape index: {}]   ;;  %s651_s4 = inlined_call_operand.vmem [shape: f32[1,64], index: 4, kind: input, shape index: {}]   ;;  %s652_s5 = inlined_call_operand.hbm [shape: bf16[64,128], index: 5, kind: input, shape index: {}]   ;;  %s653_s6 = inlined_call_operand.vmem [shape: f32[1,128], index: 6, kind: input, shape index: {}]   ;;  %s654_s7 = inlined_call_operand.hbm [shape: f32[8,128], index: 7, kind: output, shape index: {}]  }
   0x1   :  { %13 = vsyncpa [#allocation6], 0 }
   0x2   :  { %14 = vsyncpa [#allocation9], 0 }
   0x3   :  { %15 = vsyncpa [#allocation4], 0  ;;  %s515_s24 = smov [#allocation5]   ;;  %s397_s28 = scalar_lea.hbm %s648_s1, 256 }
   0x4   :  { %s31_s25 = sshll.u32 %s515_s24, 4  ;;  %p398_p0 = scmp.ne.s32.totalorder %s648_s1, %s397_s28  ;;  %s32_s25 = int_to_ptr.vmem [resolvable:$true] %s31_s25 }
   0x5   :  { %p401_p1 = scmp.lt.u32.totalorder %s397_s28, %s648_s1 }
   0x7   :  { %p403_p2 = pnand %p401_p1, %p398_p0 }
   0x9   :  { %406 = shalt.err (!%p403_p2)
}
   0xa   :  { %s407_s10 = scalar_lea.vmem %s32_s25, 256  ;;  %p412_p4 = scmp.lt.s32.totalorder %s32_s25, %s32_s25 }
   0xb   :  { %p408_p3 = scmp.ne.s32.totalorder %s32_s25, %s407_s10  ;;  %p413_p5 = scmp.lt.s32.totalorder %s407_s10, %s407_s10 }
   0xd   :  { %p414_p6 = por %p413_p5, %p412_p4 }
   0xf   :  { %p415_p7 = pnand %p414_p6, %p408_p3 }
  0x11   :  { %418 = shalt.err (!%p415_p7)
}
  0x12   :  { %s516_s11 = smov 64   ;;  %s517_s12 = smov 4  }
  0x13   :  { %37 = dma.hbm_to_vmem [thread:$0]  %s648_s1, 256, %s32_s25, [#allocation6], %s516_s11, %s516_s11, %s517_s12  }
  0x14   :  { %s518_s15 = smov [#allocation2]   ;;  %s519_s17 = smov [#allocation7]  }
  0x15   :  { %s22_s16 = sshll.u32 %s518_s15, 4  ;;  %s45_s18 = sshll.u32 %s519_s17, 4  ;;  %s23_s16 = int_to_ptr.vmem [resolvable:$true] %s22_s16  ;;  %s46_s18 = int_to_ptr.vmem [resolvable:$true] %s45_s18 }
  0x16   :  { %s419_s21 = scalar_lea.hbm %s647_s0, 128 }
  0x17   :  { %p420_p8 = scmp.ne.s32.totalorder %s647_s0, %s419_s21  ;;  %p423_p9 = scmp.lt.u32.totalorder %s419_s21, %s647_s0 }
  0x19   :  { %p425_p10 = pnand %p423_p9, %p420_p8 }
  0x1b   :  { %428 = shalt.err (!%p425_p10)
}
  0x1c   :  { %s429_s1 = scalar_lea.vmem %s23_s16, 128  ;;  %p434_p12 = scmp.lt.s32.totalorder %s23_s16, %s23_s16 }
  0x1d   :  { %p430_p11 = scmp.ne.s32.totalorder %s23_s16, %s429_s1  ;;  %p435_p13 = scmp.lt.s32.totalorder %s429_s1, %s429_s1 }
  0x1f   :  { %p436_p0 = por %p435_p13, %p434_p12 }
  0x21   :  { %p437_p1 = pnand %p436_p0, %p430_p11 }
  0x23   :  { %440 = shalt.err (!%p437_p1)
}
  0x24   :  { %25 = dma.hbm_to_vmem [thread:$0]  %s647_s0, 128, %s23_s16, [#allocation3]  }
  0x25   :  { %s441_s30 = scalar_lea.hbm %s650_s3, 256 }
  0x26   :  { %p442_p2 = scmp.ne.s32.totalorder %s650_s3, %s441_s30  ;;  %p445_p3 = scmp.lt.u32.totalorder %s441_s30, %s650_s3 }
  0x28   :  { %p447_p4 = pnand %p445_p3, %p442_p2 }
  0x2a   :  { %450 = shalt.err (!%p447_p4)
}
  0x2b   :  { %s451_s14 = scalar_lea.vmem %s46_s18, 256  ;;  %p456_p6 = scmp.lt.s32.totalorder %s46_s18, %s46_s18 }
  0x2c   :  { %p452_p5 = scmp.ne.s32.totalorder %s46_s18, %s451_s14  ;;  %p457_p7 = scmp.lt.s32.totalorder %s451_s14, %s451_s14 }
  0x2e   :  { %p458_p8 = por %p457_p7, %p456_p6 }
  0x30   :  { %p459_p9 = pnand %p458_p8, %p452_p5 }
  0x32   :  { %462 = shalt.err (!%p459_p9)
}
  0x33   :  { %51 = dma.hbm_to_vmem [thread:$0]  %s650_s3, 256, %s46_s18, [#allocation6], %s516_s11, %s516_s11, %s517_s12  }
  0x34   :  { %s520_s16 = smov [#allocation8]   ;;  %s463_s21 = scalar_lea.hbm %s652_s5, 512 }
  0x35   :  { %s59_s17 = sshll.u32 %s520_s16, 4  ;;  %p464_p10 = scmp.ne.s32.totalorder %s652_s5, %s463_s21  ;;  %s60_s17 = int_to_ptr.vmem [resolvable:$true] %s59_s17 }
  0x36   :  { %p467_p11 = scmp.lt.u32.totalorder %s463_s21, %s652_s5 }
  0x38   :  { %p469_p12 = pnand %p467_p11, %p464_p10 }
  0x3a   :  { %472 = shalt.err (!%p469_p12)
}
  0x3b   :  { %s473_s1 = scalar_lea.vmem %s60_s17, 512  ;;  %p478_p0 = scmp.lt.s32.totalorder %s60_s17, %s60_s17 }
  0x3c   :  { %p474_p13 = scmp.ne.s32.totalorder %s60_s17, %s473_s1  ;;  %p479_p1 = scmp.lt.s32.totalorder %s473_s1, %s473_s1 }
  0x3e   :  { %p480_p2 = por %p479_p1, %p478_p0 }
  0x40   :  { %p481_p3 = pnand %p480_p2, %p474_p13 }
  0x42   :  { %484 = shalt.err (!%p481_p3)
}
  0x43   :  { %65 = dma.hbm_to_vmem [thread:$0]  %s652_s5, 512, %s60_s17, [#allocation9], %s516_s11, %s516_s11, %s517_s12  }
  0x44   :  { %507 = dma.done.wait [#allocation3], 128  }
  0x45   :  { %508 = vsyncadd [#allocation3], 4294967168 }
  0x46   :  { %509 = dma.done.wait [#allocation6], 512  }
  0x47   :  { %510 = vsyncadd [#allocation6], 4294966784 }
  0x48   :  { %511 = dma.done.wait [#allocation9], 512  }
  0x49   :  { %512 = vsyncadd [#allocation9], 4294966784  ;;  %v521_v0 = vmov 0.0   ;;  %vm522_vm0 = vmmov 0   ;;  %v387_v1 = vld [vmem:[#allocation5] sm:$0xff]   ;;  %v388_v2 = vld [vmem:[#allocation5 + $0x8] sm:$0xff]  }
  0x4a   :  { %350 = vmatprep.subr.bf16.mxu1 %v521_v0  ;;  %354 = vmatprep.mubr.msk.bf16.mxu1 %vm522_vm0, %v521_v0  ;;  %v81_v3 = vld [vmem:[#allocation2] sm:$0xff]  ;;  %vm106_vm1 = vcmask 261120   ;;  %v389_v4 = vld [vmem:[#allocation7] sm:$0xff]   ;;  %v391_v7 = vld [vmem:[#allocation8] sm:$0xff]   ;;  %vm259_vm2 = vcmask 523264  }
  0x4b   :  { %366 = vmatprep.subr.bf16.mxu0 %v521_v0  ;;  %374 = vmatprep.mubr.msk.bf16.mxu0 %vm522_vm0, %v521_v0  ;;  %v82_v5 = vpack.c.bf16 %v81_v3, %v81_v3  ;;  %v390_v6 = vld [vmem:[#allocation7 + $0x8] sm:$0xff]   ;;  %v392_v8 = vld [vmem:[#allocation8 + $0x8] sm:$0xff]   ;;  %v393_v17 = vld [vmem:[#allocation8 + $0x10] sm:$0xff]  }
  0x4c   :  { %351 = vmatpush3.bf16.msra.mxu1 %v387_v1  ;;  %367 = vmatpush3.bf16.msra.mxu0 %v391_v7  ;;  %v325_v9 = vld [vmem:[%s649_s2] ss:$0 sm:$0xff] }
  0x4d   :  { %352 = vmatprep.subr.bf16.mxu1 %v521_v0  ;;  %368 = vmatprep.subr.bf16.mxu0 %v521_v0  ;;  %v394_v18 = vld [vmem:[#allocation8 + $0x18] sm:$0xff]  }
  0x4e   :  { %v329_v19 = vld [vmem:[%s651_s4] ss:$0 sm:$0xff]  ;;  %s523_s4 = smov [#allocation10]  }
  0x4f   :  { %v333_v27 = vld [vmem:[%s653_s6] ss:$0 sm:$0xff]  ;;  %s314_s28 = sshll.u32 %s523_s4, 4  ;;  %s315_s28 = int_to_ptr.vmem [resolvable:$true] %s314_s28 }
  0x50   :  { %353 = vmatpush3.bf16.msra.mxu1 %v388_v2  ;;  %369 = vmatpush3.bf16.msra.mxu0 %v392_v8  ;;  %s485_s29 = scalar_lea.vmem %s315_s28, 128  ;;  %p490_p5 = scmp.lt.s32.totalorder %s315_s28, %s315_s28 }
  0x51   :  { %358 = vmatprep.subr.bf16.mxu1 %v521_v0  ;;  %370 = vmatprep.subr.bf16.mxu0 %v521_v0  ;;  %p486_p4 = scmp.ne.s32.totalorder %s315_s28, %s485_s29  ;;  %p491_p6 = scmp.lt.s32.totalorder %s485_s29, %s485_s29 }
  0x53   :  { %355 = vmatmul.mubr.msk.bf16.vlgmr.msra.gmra.mrb[0].mxu1 %vm106_vm1, %v82_v5  ;;  %p492_p7 = por %p491_p6, %p490_p5 }
  0x54   :  { %359 = vmatpush3.bf16.msra.mxu1 %v389_v4  ;;  %362 = vmatprep.mubr.msk.bf16.mxu1 %vm522_vm0, %v521_v0 }
  0x55   :  { %360 = vmatprep.subr.bf16.mxu1 %v521_v0  ;;  %371 = vmatpush3.bf16.msra.mxu0 %v393_v17  ;;  %p493_p8 = pnand %p492_p7, %p486_p4 }
  0x56   :  { %372 = vmatprep.subr.bf16.mxu0 %v521_v0 }
  0x58   :  { %361 = vmatpush3.bf16.msra.mxu1 %v390_v6 }
  0x59   :  { %373 = vmatpush3.bf16.msra.mxu0 %v394_v18 }
 0x126   :  { %v144_v10 = vpop.f32.mrb[0].mxu1 }
 0x127   :  { %v145_v11 = vadd.f32 %v325_v9, %v144_v10  ;;  %v356_v12 = vpop.f32.mrb[1].mxu1 }
 0x128   :  { %v147_v13 = vpop.f32.mrb[2].mxu1 }
 0x129   :  { %v150_v14 = vmax.f32 %v145_v11, 0.0  ;;  %v357_v15 = vpop.f32.mrb[3].mxu1 }
 0x12b   :  { %v151_v16 = vpack.c.bf16 %v150_v14, %v150_v14 }
 0x12d   :  { %363 = vmatmul.mubr.msk.bf16.vlgmr.msra.gmra.mrb[4].mxu1 %vm106_vm1, %v151_v16 }
 0x200   :  { %v212_v20 = vpop.f32.mrb[4].mxu1 }
 0x201   :  { %v213_v21 = vadd.f32 %v329_v19, %v212_v20  ;;  %v364_v22 = vpop.f32.mrb[5].mxu1 }
 0x202   :  { %v215_v23 = vpop.f32.mrb[6].mxu1 }
 0x203   :  { %v218_v24 = vmax.f32 %v213_v21, 0.0  ;;  %v365_v25 = vpop.f32.mrb[7].mxu1 }
 0x205   :  { %v219_v26 = vpack.c.bf16 %v218_v24, %v218_v24 }
 0x207   :  { %375 = vmatmul.mubr.msk.bf16.vlgmr.msra.gmra.mrb[0].mxu0 %vm259_vm2, %v219_v26 }
 0x2da   :  { %v297_v28 = vpop.f32.mrb[0].mxu0 }
 0x2db   :  { %v298_v29 = vadd.f32 %v333_v27, %v297_v28  ;;  %v376_v30 = vpop.f32.mrb[1].mxu0 }
 0x2dc   :  { %v300_v31 = vpop.f32.mrb[2].mxu0 }
 0x2dd   :  { %v303_v32 = vmul.f32 0.5, %v298_v29  ;;  %v377_v33 = vpop.f32.mrb[3].mxu0 }
 0x2df   :  { %395 = vtanh.f32 %v303_v32 }
 0x2e9   :  { %v396_v34 = vpop.eup %395 }
 0x2ea   :  { %v305_v35 = vadd.f32 1.0, %v396_v34 }
 0x2ec   :  { %v306_v36 = vmul.f32 0.5, %v305_v35 }
 0x2ee   :  { %307 = vst [vmem:[#allocation10] sm:$0xff] %v306_v36 }
 0x2ef   :  { %496 = shalt.err (!%p493_p8)
}
 0x2f0   :  { %s497_s8 = scalar_lea.hbm %s654_s7, 128 }
 0x2f1   :  { %p498_p9 = scmp.ne.s32.totalorder %s654_s7, %s497_s8  ;;  %p501_p10 = scmp.lt.u32.totalorder %s497_s8, %s654_s7 }
 0x2f3   :  { %p503_p11 = pnand %p501_p10, %p498_p9 }
 0x2f5   :  { %506 = shalt.err (!%p503_p11)
}
 0x2f6   :  { %317 = dma.vmem_to_hbm [thread:$0]  %s315_s28, 128, %s654_s7, [#allocation4]  }
 0x2f7   :  { %513 = dma.done.wait [#allocation4], 128  }
 0x2f8   :  { %514 = vsyncadd [#allocation4], 4294967168 }
 0x2f9   :  { %321 = vsyncpa [#allocation3], 1 }
 0x2fa   :  { %322 = vsyncpa [#allocation6], 1 }
 0x2fb   :  { %323 = vsyncpa [#allocation9], 1 }
 0x2fc   :  { %324 = vsyncpa [#allocation4], 1 }

</bundles_post_ra>
